<compile_context>
chip_gen: v7x
topology: tpu7x:2x2x1
jax: 0.10.0
libtpu: 0.0.40
codegen_flags: <defaults>
</compile_context>

<pallas_src>
import functools
import math

import jax
import jax.numpy as jnp
from jax import lax
from jax.experimental import pallas as pl
from jax.experimental.pallas import tpu as pltpu


def _round_up(x: int, m: int) -> int:
    return ((x + m - 1) // m) * m


def _vmem_capacity_bytes() -> int:
    """Per-core VMEM capacity; falls back to the smallest production size
    (64 MiB / TensorCore on v7x) when the query is unavailable."""
    try:
        cap = int(pltpu.get_tpu_info().vmem_capacity_bytes)
    except Exception:
        cap = 64 * 1024 * 1024
    return max(32 << 20, min(cap, 256 << 20))


def _streamed_cols_spec(tc: int, d: int, deep: bool) -> pl.BlockSpec:
    """Cols BlockSpec for the HBM-streamed fallback; 3-deep buffering on
    v5e/v6e (128 MiB VMEM) when D is small enough that per-tile compute is
    short.  Guarded so older BlockSpec signatures still work."""
    if deep:
        try:
            return pl.BlockSpec((tc, d), lambda i, j: (j, 0),
                                pipeline_mode=pl.Buffered(3))
        except TypeError:
            pass
    return pl.BlockSpec((tc, d), lambda i, j: (j, 0))


# ----------------------------------------------------------------------------
# Pass 1: row L2-normalization (+ temperature fold) + row-wise positives
# ----------------------------------------------------------------------------
def _normalize_kernel(emb_i_ref, emb_j_ref, reps_ref, pos_ref, *, inv_temp):
    zi = emb_i_ref[...].astype(jnp.float32)            # (tb, D)
    zj = emb_j_ref[...].astype(jnp.float32)            # (tb, D)

    # F.normalize(x, dim=1): x / max(||x||, 1e-12) == x * rsqrt(max(||x||^2, 1e-24)).
    # Fold sqrt(1/T) into the same per-row scale so reps @ reps^T == logits / T.
    sqrt_it = jnp.float32(math.sqrt(inv_temp))
    si = lax.rsqrt(jnp.maximum(jnp.sum(zi * zi, axis=1, keepdims=True), 1e-24)) * sqrt_it
    sj = lax.rsqrt(jnp.maximum(jnp.sum(zj * zj, axis=1, keepdims=True), 1e-24)) * sqrt_it
    zi = zi * si
    zj = zj * sj

    # Stacked halves — no concatenate copy inside the kernel.  Zero-padded
    # input rows stay exactly zero (0 * huge_rsqrt == 0), which pass 2 relies on.
    reps_ref[0] = zi.astype(reps_ref.dtype)
    reps_ref[1] = zj.astype(reps_ref.dtype)

    # positives[k] = sim[k, k+B] = sim[k+B, k] = zi . zj  (already / T, f32 exact)
    pos = jnp.sum(zi * zj, axis=1, keepdims=True)       # (tb, 1)
    pos_ref[0] = pos
    pos_ref[1] = pos


# ----------------------------------------------------------------------------
# Pass 2a: VMEM-resident cols — grid over row tiles only, fori_loop over cols
# ----------------------------------------------------------------------------
def _rowloss_resident_kernel(rows_ref, cols_ref, pos_ref, out_ref, acc_ref,
                             *, inv_temp, n_chunks, tc, lane_w, num_pad,
                             unroll):
    acc_ref[...] = jnp.zeros_like(acc_ref)              # (tr, lane_w) f32
    tr = acc_ref.shape[0]

    def body(c, carry):
        off = pl.multiple_of(c * tc, tc)
        cols = cols_ref[pl.ds(off, tc), :]               # resident VMEM slice
        # sim chunk = rows . cols^T via contraction dims (no explicit transpose);
        # logits are already scaled by 1/T (folded in pass 1).
        sim = lax.dot_general(
            rows_ref[...], cols,
            dimension_numbers=(((1,), (1,)), ((), ())),
            preferred_element_type=jnp.float32)          # (tr, tc) f32
        e = jnp.exp(sim)
        # Lane-dense partial reduction: VALU vreg adds only; the cross-lane
        # XLU reduce happens once, in the epilogue.
        acc_ref[...] += jnp.sum(e.reshape(tr, tc // lane_w, lane_w), axis=1)
        return carry

    lax.fori_loop(0, n_chunks, body, 0, unroll=unroll)

    row_sum = jnp.sum(acc_ref[...], axis=1, keepdims=True)   # (tr, 1)
    # negatives_mask == ~eye(2B): unit rows give sim[i,i] == 1/T; zero-padded
    # columns each contribute exp(0) == 1.  Subtract both as one constant.
    denom = row_sum - jnp.float32(math.exp(inv_temp) + num_pad)
    out_ref[...] = jnp.log(denom) - pos_ref[...]


# ----------------------------------------------------------------------------
# Pass 2b: HBM-streamed cols fallback (rows "parallel", cols "arbitrary")
# ----------------------------------------------------------------------------
def _rowloss_streamed_kernel(rows_ref, cols_ref, pos_ref, out_ref, acc_ref,
                             *, inv_temp, lane_w, num_pad):
    j = pl.program_id(1)

    @pl.when(j == 0)
    def _():
        acc_ref[...] = jnp.zeros_like(acc_ref)

    sim = lax.dot_general(
        rows_ref[...], cols_ref[...],
        dimension_numbers=(((1,), (1,)), ((), ())),
        preferred_element_type=jnp.float32)              # (tr, tc) f32
    tr, tc = sim.shape
    acc_ref[...] += jnp.sum(jnp.exp(sim).reshape(tr, tc // lane_w, lane_w), axis=1)

    @pl.when(j == pl.num_programs(1) - 1)
    def _():
        row_sum = jnp.sum(acc_ref[...], axis=1, keepdims=True)
        denom = row_sum - jnp.float32(math.exp(inv_temp) + num_pad)
        out_ref[...] = jnp.log(denom) - pos_ref[...]


# ----------------------------------------------------------------------------
# Wrapper
# ----------------------------------------------------------------------------
def contrastive_loss(emb_i, emb_j, *, temperature: float = 0.5,
                     use_bf16_matmul: bool = True):
    """NT-Xent contrastive loss. emb_i, emb_j: (B, D)."""
    assert emb_i.shape == emb_j.shape and emb_i.ndim == 2
    B, D = emb_i.shape
    inv_temp = 1.0 / float(temperature)
    mm_dtype = jnp.bfloat16 if use_bf16_matmul else jnp.float32
    mm_bytes = 2 if use_bf16_matmul else 4

    # ---- per-generation VMEM budget (v7x: 64 MiB/TC, v5e/v6e: 128 MiB) ----
    vmem_cap = _vmem_capacity_bytes()
    vmem_limit = int(vmem_cap * 0.8)           # headroom for Mosaic scratch
    budget = int(vmem_limit * 0.9)             # kernel working-set target

    # ---------------- pass 1: normalize + positives ----------------
    # Per-step bytes ≈ tb * (2 inputs f32 + stacked reps + stacked pos), x2 buffers.
    per_row = 16 * D + 4 * D * mm_bytes + 16
    tb_cap = int(0.8 * vmem_limit) // max(per_row, 1)
    tb_cap = max(8, min(512, (tb_cap // 8) * 8))

    Bp8 = _round_up(B, 8)
    if Bp8 <= tb_cap:
        tb, Bp = Bp8, Bp8
    else:  # near-even split into tiles <= tb_cap, multiple of 8
        n_tiles = -(-B // tb_cap)
        tb = _round_up(-(-B // n_tiles), 8)
        Bp = _round_up(B, tb)

    if Bp != B:
        emb_i = jnp.pad(emb_i, ((0, Bp - B), (0, 0)))
        emb_j = jnp.pad(emb_j, ((0, Bp - B), (0, 0)))

    reps_s, pos_s = pl.pallas_call(
        functools.partial(_normalize_kernel, inv_temp=inv_temp),
        out_shape=(jax.ShapeDtypeStruct((2, Bp, D), mm_dtype),
                   jax.ShapeDtypeStruct((2, Bp, 1), jnp.float32)),
        grid=(Bp // tb,),
        in_specs=[pl.BlockSpec((tb, D), lambda i: (i, 0)),
                  pl.BlockSpec((tb, D), lambda i: (i, 0))],
        out_specs=(pl.BlockSpec((2, tb, D), lambda i: (0, i, 0)),
                   pl.BlockSpec((2, tb, 1), lambda i: (0, i, 0))),
        compiler_params=pltpu.CompilerParams(
            dimension_semantics=("parallel",),
            vmem_limit_bytes=vmem_limit),
    )(emb_i, emb_j)

    reps = reps_s.reshape(2 * Bp, D)   # contiguous: metadata-only reshape
    pos = pos_s.reshape(2 * Bp, 1)
    Np = 2 * Bp

    # ---------------- pass 2: tiled denominator / per-row loss ----------------
    Np8 = _round_up(Np, 8)
    if Np8 <= 512:
        # Small problem: a single resident tile covers everything.
        Np_pad, tr, tc = Np8, Np8, Np8
        resident = True
    else:
        tc = 512                                   # 256-aligned for the 2x256 MXU
        tr_res = 256                               # MXU-bound once cols are resident
        tr_str = 1024 if vmem_cap >= (100 << 20) else 512   # roofline crossover
        Np_pad_try = _round_up(Np, max(tr_res, tc))
        resident_bytes = (2 * Np_pad_try * D * mm_bytes      # cols (2 buffers)
                          + 2 * tr_res * D * mm_bytes        # rows (2 buffers)
                          + tr_res * 128 * 4 + 16 * tr_res)  # acc + pos/out
        if resident_bytes <= budget:
            resident, tr, Np_pad = True, tr_res, Np_pad_try
        else:
            resident, tr = False, tr_str
            while tr > 64 and (2 * (tr + tc) * D * mm_bytes
                               + tr * 128 * 4 + 16 * tr) > budget:
                tr //= 2
            Np_pad = _round_up(Np, max(tr, tc))

    if Np_pad != Np:
        reps = jnp.pad(reps, ((0, Np_pad - Np), (0, 0)))
        pos = jnp.pad(pos, ((0, Np_pad - Np), (0, 0)))

    num_pad = Np_pad - 2 * B               # zero rows: each adds exp(0)=1 per denom
    lane_w = 128 if tc % 128 == 0 else tc  # lane-dense accumulator width

    if resident:
        n_chunks = Np_pad // tc
        row_losses = pl.pallas_call(
            functools.partial(_rowloss_resident_kernel, inv_temp=inv_temp,
                              n_chunks=n_chunks, tc=tc, lane_w=lane_w,
                              num_pad=num_pad, unroll=(n_chunks <= 8)),
            out_shape=jax.ShapeDtypeStruct((Np_pad, 1), jnp.float32),
            grid=(Np_pad // tr,),
            in_specs=[pl.BlockSpec((tr, D), lambda i: (i, 0)),        # row tile
                      pl.BlockSpec((Np_pad, D), lambda i: (0, 0)),    # resident cols
                      pl.BlockSpec((tr, 1), lambda i: (i, 0))],       # positives
            out_specs=pl.BlockSpec((tr, 1), lambda i: (i, 0)),
            scratch_shapes=[pltpu.VMEM((tr, lane_w), jnp.float32)],
            compiler_params=pltpu.CompilerParams(
                dimension_semantics=("parallel",),
                vmem_limit_bytes=vmem_limit),
        )(reps, reps, pos)
    else:
        deep = (vmem_cap >= (100 << 20)) and (D <= 512)
        row_losses = pl.pallas_call(
            functools.partial(_rowloss_streamed_kernel, inv_temp=inv_temp,
                              lane_w=lane_w, num_pad=num_pad),
            out_shape=jax.ShapeDtypeStruct((Np_pad, 1), jnp.float32),
            grid=(Np_pad // tr, Np_pad // tc),
            in_specs=[pl.BlockSpec((tr, D), lambda i, j: (i, 0)),
                      _streamed_cols_spec(tc, D, deep),
                      pl.BlockSpec((tr, 1), lambda i, j: (i, 0))],
            out_specs=pl.BlockSpec((tr, 1), lambda i, j: (i, 0)),
            scratch_shapes=[pltpu.VMEM((tr, lane_w), jnp.float32)],
            compiler_params=pltpu.CompilerParams(
                dimension_semantics=("parallel", "arbitrary"),
                vmem_limit_bytes=vmem_limit),
        )(reps, reps, pos)

    # Final O(N) reduction in plain JAX (keeps the row axis "parallel").
    # Valid rows are [0, B) (z_i half) and [Bp, Bp + B) (z_j half); padded
    # rows are discarded here.
    loss_i = jnp.sum(row_losses[:B, 0])
    loss_j = jnp.sum(row_losses[Bp:Bp + B, 0])
    return (loss_i + loss_j) / (2 * B)


# ----------------------------------------------------------------------------
# Plain-JAX reference mirroring the PyTorch module
# ----------------------------------------------------------------------------
def _reference_loss(emb_i, emb_j, temperature=0.5):
    B = emb_i.shape[0]
    zi = emb_i / jnp.maximum(jnp.linalg.norm(emb_i, axis=1, keepdims=True), 1e-12)
    zj = emb_j / jnp.maximum(jnp.linalg.norm(emb_j, axis=1, keepdims=True), 1e-12)
    reps = jnp.concatenate([zi, zj], axis=0)
    sim = reps @ reps.T
    sim_ij = jnp.diagonal(sim, offset=B)
    sim_ji = jnp.diagonal(sim, offset=-B)
    positives = jnp.concatenate([sim_ij, sim_ji], axis=0)
    neg_mask = 1.0 - jnp.eye(2 * B)
    nominator = jnp.exp(positives / temperature)
    denominator = jnp.sum(neg_mask * jnp.exp(sim / temperature), axis=1)
    loss_partial = -jnp.log(nominator / denominator)
    return jnp.sum(loss_partial) / (2 * B)


if __name__ == "__main__":
    batch_size = 4
    hidden = 32          # NOTE: D < 128 under-fills vreg lanes / MXU depth;
                         # at production sizes D is typically >= 128.
    temperature = 0.5

    key = jax.random.PRNGKey(0)
    k1, k2 = jax.random.split(key)
    emb_i = jax.random.normal(k1, (batch_size, hidden), dtype=jnp.float32)
    emb_j = jax.random.normal(k2, (batch_size, hidden), dtype=jnp.float32)

    ref = _reference_loss(emb_i, emb_j, temperature)

    # Exact path (f32 MXU inputs): tight tolerance vs. the f32 reference.
    loss_f32 = contrastive_loss(emb_i, emb_j, temperature=temperature,
                                use_bf16_matmul=False)
    jax.block_until_ready(loss_f32)
    assert jnp.allclose(loss_f32, ref, rtol=1e-5, atol=1e-5), (loss_f32, ref)

    # Fast path (bf16 MXU inputs, f32 accumulation): looser tolerance.
    loss_bf16 = contrastive_loss(emb_i, emb_j, temperature=temperature,
                                 use_bf16_matmul=True)
    jax.block_until_ready(loss_bf16)
    assert jnp.allclose(loss_bf16, ref, rtol=3e-2, atol=3e-2), (loss_bf16, ref)

    print("KERNEL_OK")
</pallas_src>

<mosaic_0001>
module attributes {stable_mosaic.version = 11 : i64} {
  func.func @_normalize_kernel(%arg0: i32, %arg1: memref<8x32xf32, #tpu.memory_space<vmem>>, %arg2: memref<8x32xf32, #tpu.memory_space<vmem>>, %arg3: memref<2x8x32xf32, #tpu.memory_space<vmem>>, %arg4: memref<2x8x1xf32, #tpu.memory_space<vmem>>) attributes {dimension_semantics = [#tpu.dimension_semantics<parallel>], iteration_bounds = array<i64: 1>, scalar_prefetch = 0 : i64, scratch_operands = 0 : i64, tpu.core_type = #tpu.core_type<tc>, window_params = [{transform_indices = @transform_0, window_bounds = array<i64: 8, 32>}, {transform_indices = @transform_1, window_bounds = array<i64: 8, 32>}, {transform_indices = @transform_2, window_bounds = array<i64: 2, 8, 32>}, {transform_indices = @transform_3, window_bounds = array<i64: 2, 8, 1>}]} {
    %c0 = arith.constant 0 : index
    %c0_0 = arith.constant 0 : index
    %0 = vector.load %arg1[%c0, %c0_0] : memref<8x32xf32, #tpu.memory_space<vmem>>, vector<8x32xf32>
    %c0_1 = arith.constant 0 : index
    %c0_2 = arith.constant 0 : index
    %1 = vector.load %arg2[%c0_1, %c0_2] : memref<8x32xf32, #tpu.memory_space<vmem>>, vector<8x32xf32>
    %2 = arith.mulf %0, %0 : vector<8x32xf32>
    %cst = arith.constant dense<0.000000e+00> : vector<8xf32>
    %3 = vector.multi_reduction <add>, %2, %cst [1] : vector<8x32xf32> to vector<8xf32>
    %4 = vector.shape_cast %3 : vector<8xf32> to vector<8x1xf32>
    %cst_3 = arith.constant 1.000000e-24 : f32
    %5 = vector.broadcast %cst_3 : f32 to vector<8x1xf32>
    %6 = arith.maximumf %4, %5 : vector<8x1xf32>
    %7 = math.rsqrt %6 : vector<8x1xf32>
    %cst_4 = arith.constant 1.41421354 : f32
    %8 = vector.broadcast %cst_4 : f32 to vector<8x1xf32>
    %9 = arith.mulf %7, %8 : vector<8x1xf32>
    %10 = arith.mulf %1, %1 : vector<8x32xf32>
    %cst_5 = arith.constant dense<0.000000e+00> : vector<8xf32>
    %11 = vector.multi_reduction <add>, %10, %cst_5 [1] : vector<8x32xf32> to vector<8xf32>
    %12 = vector.shape_cast %11 : vector<8xf32> to vector<8x1xf32>
    %cst_6 = arith.constant 1.000000e-24 : f32
    %13 = vector.broadcast %cst_6 : f32 to vector<8x1xf32>
    %14 = arith.maximumf %12, %13 : vector<8x1xf32>
    %15 = math.rsqrt %14 : vector<8x1xf32>
    %cst_7 = arith.constant 1.41421354 : f32
    %16 = vector.broadcast %cst_7 : f32 to vector<8x1xf32>
    %17 = arith.mulf %15, %16 : vector<8x1xf32>
    %18 = vector.broadcast %9 : vector<8x1xf32> to vector<8x32xf32>
    %19 = arith.mulf %0, %18 : vector<8x32xf32>
    %20 = vector.broadcast %17 : vector<8x1xf32> to vector<8x32xf32>
    %21 = arith.mulf %1, %20 : vector<8x32xf32>
    %c0_8 = arith.constant 0 : index
    %c0_9 = arith.constant 0 : index
    %c0_10 = arith.constant 0 : index
    %22 = vector.load %arg3[%c0_8, %c0_9, %c0_10] : memref<2x8x32xf32, #tpu.memory_space<vmem>>, vector<1x8x32xf32>
    %23 = vector.shape_cast %22 : vector<1x8x32xf32> to vector<8x32xf32>
    %24 = vector.shape_cast %19 : vector<8x32xf32> to vector<1x8x32xf32>
    tpu.vector_store %arg3[%c0_8, %c0_9, %c0_10], %24 {strides = array<i32>} : memref<2x8x32xf32, #tpu.memory_space<vmem>>, vector<1x8x32xf32>,
    %c1 = arith.constant 1 : index
    %c0_11 = arith.constant 0 : index
    %c0_12 = arith.constant 0 : index
    %25 = vector.load %arg3[%c1, %c0_11, %c0_12] : memref<2x8x32xf32, #tpu.memory_space<vmem>>, vector<1x8x32xf32>
    %26 = vector.shape_cast %25 : vector<1x8x32xf32> to vector<8x32xf32>
    %27 = vector.shape_cast %21 : vector<8x32xf32> to vector<1x8x32xf32>
    tpu.vector_store %arg3[%c1, %c0_11, %c0_12], %27 {strides = array<i32>} : memref<2x8x32xf32, #tpu.memory_space<vmem>>, vector<1x8x32xf32>,
    %28 = arith.mulf %19, %21 : vector<8x32xf32>
    %cst_13 = arith.constant dense<0.000000e+00> : vector<8xf32>
    %29 = vector.multi_reduction <add>, %28, %cst_13 [1] : vector<8x32xf32> to vector<8xf32>
    %30 = vector.shape_cast %29 : vector<8xf32> to vector<8x1xf32>
    %c0_14 = arith.constant 0 : index
    %c0_15 = arith.constant 0 : index
    %c0_16 = arith.constant 0 : index
    %31 = vector.load %arg4[%c0_14, %c0_15, %c0_16] : memref<2x8x1xf32, #tpu.memory_space<vmem>>, vector<1x8x1xf32>
    %32 = vector.shape_cast %31 : vector<1x8x1xf32> to vector<8x1xf32>
    %33 = vector.shape_cast %30 : vector<8x1xf32> to vector<1x8x1xf32>
    tpu.vector_store %arg4[%c0_14, %c0_15, %c0_16], %33 {strides = array<i32>} : memref<2x8x1xf32, #tpu.memory_space<vmem>>, vector<1x8x1xf32>,
    %c1_17 = arith.constant 1 : index
    %c0_18 = arith.constant 0 : index
    %c0_19 = arith.constant 0 : index
    %34 = vector.load %arg4[%c1_17, %c0_18, %c0_19] : memref<2x8x1xf32, #tpu.memory_space<vmem>>, vector<1x8x1xf32>
    %35 = vector.shape_cast %34 : vector<1x8x1xf32> to vector<8x1xf32>
    %36 = vector.shape_cast %30 : vector<8x1xf32> to vector<1x8x1xf32>
    tpu.vector_store %arg4[%c1_17, %c0_18, %c0_19], %36 {strides = array<i32>} : memref<2x8x1xf32, #tpu.memory_space<vmem>>, vector<1x8x1xf32>,
    return
  }
  func.func @transform_0(%arg0: i32) -> (i32, i32) {
    %c0_i32 = arith.constant 0 : i32
    %c0_i32_0 = arith.constant 0 : i32
    return %arg0, %c0_i32 : i32, i32
  }
  func.func @transform_1(%arg0: i32) -> (i32, i32) {
    %c0_i32 = arith.constant 0 : i32
    %c0_i32_0 = arith.constant 0 : i32
    return %arg0, %c0_i32 : i32, i32
  }
  func.func @transform_2(%arg0: i32) -> (i32, i32, i32) {
    %c0_i32 = arith.constant 0 : i32
    %c0_i32_0 = arith.constant 0 : i32
    %c0_i32_1 = arith.constant 0 : i32
    return %c0_i32, %arg0, %c0_i32_0 : i32, i32, i32
  }
  func.func @transform_3(%arg0: i32) -> (i32, i32, i32) {
    %c0_i32 = arith.constant 0 : i32
    %c0_i32_0 = arith.constant 0 : i32
    %c0_i32_1 = arith.constant 0 : i32
    return %c0_i32, %arg0, %c0_i32_0 : i32, i32, i32
  }
}

</mosaic_0001>

<bundles_post_ra>
// kernel: tpu_custom_call.1
= control target key start
LH: loop header
LB: loop body
LE: loop exit
PB: predicated region body
PF: predicated region fallthrough
CT: control target
= control target key end

     0   :  { %9 = vsyncpa [#allocation3], 0  ;;  %s244_s0 = inlined_call_operand.hbm [shape: f32[8,32], index: 0, kind: input, shape index: {}]   ;;  %s245_s1 = inlined_call_operand.hbm [shape: f32[8,32], index: 1, kind: input, shape index: {}]   ;;  %s246_s2 = inlined_call_operand.hbm [shape: f32[2,8,32], index: 2, kind: output, shape index: {0}]   ;;  %s247_s3 = inlined_call_operand.vmem [shape: f32[2,8,1], index: 3, kind: output, shape index: {1}]  }
   0x1   :  { %10 = vsyncpa [#allocation6], 0 }
   0x2   :  { %11 = vsyncpa [#allocation4], 0  ;;  %s172_s12 = smov [#allocation2]   ;;  %s173_s14 = smov [#allocation5]  }
   0x3   :  { %s18_s13 = sshll.u32 %s172_s12, 4  ;;  %s28_s15 = sshll.u32 %s173_s14, 4  ;;  %s19_s13 = int_to_ptr.vmem [resolvable:$true] %s18_s13  ;;  %s29_s15 = int_to_ptr.vmem [resolvable:$true] %s28_s15 }
   0x4   :  { %s100_s18 = scalar_lea.hbm %s244_s0, 128 }
   0x5   :  { %p101_p0 = scmp.ne.s32.totalorder %s244_s0, %s100_s18  ;;  %p104_p1 = scmp.lt.u32.totalorder %s100_s18, %s244_s0 }
   0x7   :  { %p106_p2 = pnand %p104_p1, %p101_p0 }
   0x9   :  { %109 = shalt.err (!%p106_p2)
}
   0xa   :  { %s110_s23 = scalar_lea.vmem %s19_s13, 128  ;;  %p115_p4 = scmp.lt.s32.totalorder %s19_s13, %s19_s13 }
   0xb   :  { %p111_p3 = scmp.ne.s32.totalorder %s19_s13, %s110_s23  ;;  %p116_p5 = scmp.lt.s32.totalorder %s110_s23, %s110_s23 }
   0xd   :  { %p117_p6 = por %p116_p5, %p115_p4 }
   0xf   :  { %p118_p7 = pnand %p117_p6, %p111_p3 }
  0x11   :  { %121 = shalt.err (!%p118_p7)
}
  0x12   :  { %21 = dma.hbm_to_vmem [thread:$0]  %s244_s0, 128, %s19_s13, [#allocation3]  }
  0x13   :  { %s122_s28 = scalar_lea.hbm %s245_s1, 128 }
  0x14   :  { %p123_p8 = scmp.ne.s32.totalorder %s245_s1, %s122_s28  ;;  %p126_p9 = scmp.lt.u32.totalorder %s122_s28, %s245_s1 }
  0x16   :  { %p128_p10 = pnand %p126_p9, %p123_p8 }
  0x18   :  { %131 = shalt.err (!%p128_p10)
}
  0x19   :  { %s132_s6 = scalar_lea.vmem %s29_s15, 128  ;;  %p137_p12 = scmp.lt.s32.totalorder %s29_s15, %s29_s15 }
  0x1a   :  { %p133_p11 = scmp.ne.s32.totalorder %s29_s15, %s132_s6  ;;  %p138_p13 = scmp.lt.s32.totalorder %s132_s6, %s132_s6 }
  0x1c   :  { %p139_p0 = por %p138_p13, %p137_p12 }
  0x1e   :  { %p140_p1 = pnand %p139_p0, %p133_p11 }
  0x20   :  { %143 = shalt.err (!%p140_p1)
}
  0x21   :  { %31 = dma.hbm_to_vmem [thread:$0]  %s245_s1, 128, %s29_s15, [#allocation6]  }
  0x22   :  { %166 = dma.done.wait [#allocation3], 128  }
  0x23   :  { %167 = vsyncadd [#allocation3], 4294967168 }
  0x24   :  { %168 = dma.done.wait [#allocation6], 128  }
  0x25   :  { %169 = vsyncadd [#allocation6], 4294967168  ;;  %v38_v0 = vld [vmem:[#allocation2] sm:$0xff]  ;;  %vm41_vm0 = vcmask 261120   ;;  %v39_v1 = vld [vmem:[#allocation5] sm:$0xff]  ;;  %s174_s1 = smov [#allocation7]  }
  0x26   :  { %v40_v2 = vmul.f32 %v38_v0, %v38_v0  ;;  %v48_v3 = vmul.f32 %v39_v1, %v39_v1  ;;  %s73_s8 = sshll.u32 %s174_s1, 4  ;;  %s74_s8 = int_to_ptr.vmem [resolvable:$true] %s73_s8 }
  0x27   :  { %s144_s9 = scalar_lea.vmem %s74_s8, 256  ;;  %p149_p3 = scmp.lt.s32.totalorder %s74_s8, %s74_s8 }
  0x28   :  { %v42_v4 = vsel %vm41_vm0, %v40_v2, 0.0  ;;  %v49_v5 = vsel %vm41_vm0, %v48_v3, 0.0  ;;  %p145_p2 = scmp.ne.s32.totalorder %s74_s8, %s144_s9  ;;  %p150_p4 = scmp.lt.s32.totalorder %s144_s9, %s144_s9 }
  0x29   :  { %43 = vadd.xlane.f32.xlu0 %v42_v4 }
  0x2a   :  { %p151_p5 = por %p150_p4, %p149_p3 }
  0x2c   :  { %p152_p6 = pnand %p151_p5, %p145_p2 }
  0x2d   :  { %50 = vadd.xlane.f32.xlu0 %v49_v5 }
  0xb6   :  { %v44_v6 = vpop.xlane.xlu0 %43 }
  0xb7   :  { %v45_v7 = vmax.f32 %v44_v6, 1e-24 }
  0xb9   :  { %96 = vrsqrt.f32 %v45_v7 }
  0xba   :  { %v51_v8 = vpop.xlane.xlu0 %50 }
  0xbb   :  { %v52_v9 = vmax.f32 %v51_v8, 1e-24 }
  0xbd   :  { %98 = vrsqrt.f32 %v52_v9 }
  0xc3   :  { %v97_v10 = vpop.eup %96 }
  0xc4   :  { %v47_v11 = vmul.f32 1.4142135, %v97_v10 }
  0xc6   :  { %v55_v12 = vmul.f32 %v47_v11, %v38_v0 }
  0xc7   :  { %v99_v13 = vpop.eup %98 }
  0xc8   :  { %v54_v14 = vmul.f32 1.4142135, %v99_v13  ;;  %57 = vst.msk [vmem:[#allocation7] sm:$0xff] %vm41_vm0, %v55_v12 }
  0xca   :  { %v56_v15 = vmul.f32 %v54_v14, %v39_v1 }
  0xcc   :  { %v60_v16 = vmul.f32 %v56_v15, %v55_v12  ;;  %59 = vst.msk [vmem:[#allocation7 + $0x8] sm:$0xff] %vm41_vm0, %v56_v15 }
  0xce   :  { %v61_v17 = vsel %vm41_vm0, %v60_v16, 0.0 }
  0xcf   :  { %62 = vadd.xlane.f32.xlu1 %v61_v17 }
  0xd0   :  { %155 = shalt.err (!%p152_p6)
}
  0xd1   :  { %s156_s12 = scalar_lea.hbm %s246_s2, 256 }
  0xd2   :  { %p157_p7 = scmp.ne.s32.totalorder %s246_s2, %s156_s12  ;;  %p160_p8 = scmp.lt.u32.totalorder %s156_s12, %s246_s2 }
  0xd4   :  { %p162_p9 = pnand %p160_p8, %p157_p7 }
  0xd6   :  { %165 = shalt.err (!%p162_p9)
}
  0xd7   :  { %s175_s17 = smov 128   ;;  %s176_s18 = smov 8   ;;  %vm64_vm1 = vcmask 7168  }
  0xd8   :  { %79 = dma.vmem_to_hbm [thread:$0]  %s74_s8, 256, %s246_s2, [#allocation4], %s175_s17, %s175_s17, %s176_s18  }
 0x15c   :  { %v63_v18 = vpop.xlane.xlu1 %62 }
 0x15d   :  { %65 = vst.msk [vmem:[%s247_s3] sm:$0xff] %vm64_vm1, %v63_v18  ;;  %90 = vst.msk [vmem:[%s247_s3 + $0x8] sm:$0xff] %vm64_vm1, %v63_v18 }
 0x15e   :  { %170 = dma.done.wait [#allocation4], 256  }
 0x15f   :  { %171 = vsyncadd [#allocation4], 4294967040 }
 0x160   :  { %87 = vsyncpa [#allocation3], 1 }
 0x161   :  { %88 = vsyncpa [#allocation6], 1 }
 0x162   :  { %89 = vsyncpa [#allocation4], 1 }

</bundles_post_ra>
